<compile_context>
chip_gen: v6e
topology: v6e:2x2x1
jax: 0.10.0
libtpu: 0.0.40
codegen_flags: <defaults>
</compile_context>

<pallas_src>
import functools

import jax
import jax.numpy as jnp
from jax.experimental import pallas as pl
from jax.experimental.pallas import tpu as pltpu

ALPHA = 0.75
GAMMA = 2.0                      # statically 2 -> implemented as q*q in the kernel

_TILE_BYTES = 8 * 1024 * 1024    # logits DMA tile budget per buffer
_SUB_ELEMS = 32 * 1024           # target elements per in-kernel compute sub-chunk


def _num_parallel_cores():
    # 2 TensorCores visible to one Pallas grid: v4/v5p (megacore) and v7x.
    # v5e / v6e have a single TensorCore, where a core axis only adds padding.
    try:
        kind = jax.devices()[0].device_kind.lower()
    except Exception:
        return 1
    return 2 if any(tag in kind for tag in ("v7", "v4", "v5p")) else 1


def _choose_tiling(n_rows, c, itemsize):
    # SUB: rows per in-kernel compute sub-chunk (keeps f32 intermediates small).
    sub = max(8, min(128, (_SUB_ELEMS // max(c, 1)) // 8 * 8))
    sub = min(sub, max(8, n_rows // 8 * 8))          # never exceed the (8-aligned) batch
    # tile_n: rows per grid step / DMA block; multiple of sub, <= n_rows, <= ~8 MiB.
    budget = max(sub, (_TILE_BYTES // (itemsize * c)) // sub * sub)
    tile_n = max(sub, min(budget, n_rows // sub * sub))
    return tile_n, sub


def focal_loss_kernel(logits_ref, targets_ref, out_ref, *,
                      n_total, tile_n, sub, tiles_per_core):
    # logits_ref:  (tile_n, C)            f32/bf16
    # targets_ref: (tile_n // sub, sub)   int32 (lane-dense, leading tile dim squeezed)
    # out_ref:     (1, 1)                 f32 per-core partial sum (accumulator)
    step = pl.program_id(1)

    @pl.when(step == 0)
    def _():
        out_ref[...] = jnp.zeros_like(out_ref)

    c = logits_ref.shape[-1]
    n_sub = tile_n // sub

    # Unclamped global tile index (index_maps are clamped; rows of duplicate or
    # ragged tiles are zeroed by the global-row mask below).
    tile_idx = pl.program_id(0) * tiles_per_core + step
    base_row = tile_idx * tile_n

    # Loop-invariant pieces: identity mask for the lane->sublane relayout of the
    # targets row, class-index iota, and a per-sub-chunk row iota.
    rr = jax.lax.broadcasted_iota(jnp.int32, (sub, sub), 0)
    cc = jax.lax.broadcasted_iota(jnp.int32, (sub, sub), 1)
    ident = (rr == cc).astype(jnp.float32)                        # (sub, sub)
    cls = jax.lax.broadcasted_iota(jnp.int32, (sub, c), 1)        # (sub, C)
    sub_row = jax.lax.broadcasted_iota(jnp.int32, (sub, 1), 0)    # (sub, 1)

    def body(j, acc):
        r0 = pl.multiple_of(j * sub, sub)
        x = logits_ref[pl.ds(r0, sub), :].astype(jnp.float32)     # (sub, C)

        # Lane-dense (1, sub) targets row -> (sub, 1) column via diagonal extraction
        # (multiply by the identity mask, reduce over lanes): guaranteed lowering.
        t_row = targets_ref[pl.ds(j, 1), :].astype(jnp.float32)   # (1, sub)
        t_col = jnp.sum(ident * t_row, axis=1,
                        keepdims=True).astype(jnp.int32)          # (sub, 1)

        # Numerically stable log-softmax pieces along the class (lane) axis.
        m = jnp.max(x, axis=-1, keepdims=True)
        z = x - m
        lse = jnp.log(jnp.sum(jnp.exp(z), axis=-1, keepdims=True))

        # z[target] per row without materializing log-probs or a float one-hot.
        z_t = jnp.sum(jnp.where(cls == t_col, z, 0.0), axis=-1, keepdims=True)

        logp_t = z_t - lse
        ce = -logp_t
        p_t = jnp.exp(logp_t)
        q = 1.0 - p_t
        focal = ALPHA * (q * q) * ce                              # gamma == 2 -> q*q

        # Mask rows past the true batch size (ragged last tile, duplicate tiles).
        valid = (base_row + r0 + sub_row) < n_total
        focal = jnp.where(valid, focal, 0.0)
        return acc + jnp.sum(focal, axis=0, keepdims=True)        # (1, 1)

    total = jax.lax.fori_loop(0, n_sub, body, jnp.zeros((1, 1), jnp.float32))
    out_ref[...] += total


def focal_loss(logits, targets):
    """Mean focal loss. logits: (N, C) f32/bf16 logits, targets: (N,) int class ids."""
    n, c = logits.shape
    n_rows = n
    if n_rows < 8:   # tiny-batch corner: pad to one 8-row sublane tile (negligible)
        logits = jnp.pad(logits, ((0, 8 - n_rows), (0, 0)))
        n_rows = 8

    itemsize = jnp.dtype(logits.dtype).itemsize
    tile_n, sub = _choose_tiling(n_rows, c, itemsize)
    num_tiles = pl.cdiv(n_rows, tile_n)
    num_cores = _num_parallel_cores()
    tiles_per_core = pl.cdiv(num_tiles, num_cores)
    last_tile = num_tiles - 1

    # Lane-dense targets: (num_tiles, tile_n // sub, sub) int32, contiguous DMA rows.
    rows = num_tiles * tile_n
    t = targets.astype(jnp.int32).reshape(-1)
    if rows > n:
        t = jnp.pad(t, (0, rows - n))   # tiny (int32); the (N, C) logits are NOT padded
    t3 = t.reshape(num_tiles, tile_n // sub, sub)

    def tile_map(ci, ti):
        # Clamp so no block starts past the end of the arrays; rows of duplicate
        # tiles are zeroed in-kernel by the global-row mask.
        return jnp.minimum(ci * tiles_per_core + ti, last_tile)

    kernel = functools.partial(
        focal_loss_kernel, n_total=n, tile_n=tile_n, sub=sub,
        tiles_per_core=tiles_per_core)

    cost = pl.CostEstimate(
        flops=10 * n * c,
        transcendentals=n * (c + 2),
        bytes_accessed=n * c * itemsize + n * 4 + num_cores * 4)

    partials = pl.pallas_call(
        kernel,
        out_shape=jax.ShapeDtypeStruct((num_cores, 1), jnp.float32),
        grid_spec=pltpu.PrefetchScalarGridSpec(
            num_scalar_prefetch=0,
            grid=(num_cores, tiles_per_core),
            in_specs=[
                pl.BlockSpec((tile_n, c), lambda ci, ti: (tile_map(ci, ti), 0)),
                pl.BlockSpec((None, tile_n // sub, sub),
                             lambda ci, ti: (tile_map(ci, ti), 0, 0)),
            ],
            out_specs=pl.BlockSpec((1, 1), lambda ci, ti: (ci, 0)),
        ),
        compiler_params=pltpu.CompilerParams(
            dimension_semantics=("parallel", "arbitrary"),
            vmem_limit_bytes=32 * 1024 * 1024,
        ),
        cost_estimate=cost,
    )(logits, t3)

    # Per-core partial sums -> mean over the true (unpadded) batch size.
    return jnp.sum(partials) / jnp.float32(n)


def focal_loss_ref(logits, targets):
    logp = jax.nn.log_softmax(logits.astype(jnp.float32), axis=-1)
    ce = -jnp.take_along_axis(logp, targets.astype(jnp.int32)[:, None], axis=-1)[:, 0]
    p_t = jnp.exp(-ce)
    return jnp.mean(ALPHA * (1.0 - p_t) ** GAMMA * ce)


if __name__ == "__main__":
    key = jax.random.PRNGKey(0)
    k1, k2, k3, k4, k5, k6 = jax.random.split(key, 6)

    # Small shapes consistent with the module: a batch of class logits.
    n1, c1 = 8, 128
    logits1 = jax.random.normal(k1, (n1, c1), dtype=jnp.float32)
    targets1 = jax.random.randint(k2, (n1,), 0, c1, dtype=jnp.int32)
    out1 = focal_loss(logits1, targets1)
    jax.block_until_ready(out1)
    ref1 = focal_loss_ref(logits1, targets1)
    assert jnp.allclose(out1, ref1, rtol=1e-5, atol=1e-6), (out1, ref1)

    # Ragged batch + odd class count: exercises the masked partial tile
    # (logits are never padded in the wrapper).
    n2, c2 = 300, 37
    logits2 = jax.random.normal(k3, (n2, c2), dtype=jnp.float32)
    targets2 = jax.random.randint(k4, (n2,), 0, c2, dtype=jnp.int32)
    out2 = focal_loss(logits2, targets2)
    jax.block_until_ready(out2)
    ref2 = focal_loss_ref(logits2, targets2)
    assert jnp.allclose(out2, ref2, rtol=1e-5, atol=1e-6), (out2, ref2)

    # bf16 logits pass straight through (kernel upcasts to f32 internally).
    n3, c3 = 64, 128
    logits3 = jax.random.normal(k5, (n3, c3), dtype=jnp.bfloat16)
    targets3 = jax.random.randint(k6, (n3,), 0, c3, dtype=jnp.int32)
    out3 = focal_loss(logits3, targets3)
    jax.block_until_ready(out3)
    ref3 = focal_loss_ref(logits3.astype(jnp.float32), targets3)
    assert jnp.allclose(out3, ref3, rtol=1e-4, atol=1e-5), (out3, ref3)

    print("KERNEL_OK")
</pallas_src>

<mosaic_0001>
module attributes {stable_mosaic.version = 11 : i64} {
  func.func @focal_loss_kernel(%arg0: i32, %arg1: i32, %arg2: memref<8x128xf32, #tpu.memory_space<vmem>>, %arg3: memref<1x1x8xi32, #tpu.memory_space<vmem>>, %arg4: memref<1x1xf32, #tpu.memory_space<vmem>>) attributes {dimension_semantics = [#tpu.dimension_semantics<parallel>, #tpu.dimension_semantics<arbitrary>], iteration_bounds = array<i64: 1, 1>, scalar_prefetch = 0 : i64, scratch_operands = 0 : i64, tpu.core_type = #tpu.core_type<tc>, window_params = [{transform_indices = @transform_0, window_bounds = array<i64: 8, 128>}, {transform_indices = @transform_1, window_bounds = array<i64: 1, 1, 8>}, {transform_indices = @transform_2, window_bounds = array<i64: 1, 1>}]} {
    %c0_i32 = arith.constant 0 : i32
    %0 = arith.cmpi eq, %arg1, %c0_i32 : i32
    %1 = arith.extui %0 : i1 to i32
    %c0_i32_0 = arith.constant 0 : i32
    %2 = arith.cmpi ne, %1, %c0_i32_0 : i32
    scf.if %2 {
      %cst_21 = arith.constant 0.000000e+00 : f32
      %64 = vector.broadcast %cst_21 : f32 to vector<1x1xf32>
      %c0_22 = arith.constant 0 : index
      %c0_23 = arith.constant 0 : index
      %65 = vector.load %arg4[%c0_22, %c0_23] : memref<1x1xf32, #tpu.memory_space<vmem>>, vector<1x1xf32>
      tpu.vector_store %arg4[%c0_22, %c0_23], %64 {strides = array<i32>} : memref<1x1xf32, #tpu.memory_space<vmem>>, vector<1x1xf32>,
    } else {
    }
    %c1_i32 = arith.constant 1 : i32
    %3 = arith.muli %arg0, %c1_i32 : i32
    %4 = arith.addi %3, %arg1 : i32
    %c8_i32 = arith.constant 8 : i32
    %5 = arith.muli %4, %c8_i32 : i32
    %6 = tpu.iota {dimensions = array<i32: 0>} : vector<8x8xi32>
    %7 = tpu.iota {dimensions = array<i32: 1>} : vector<8x8xi32>
    %8 = arith.cmpi eq, %6, %7 : vector<8x8xi32>
    %9 = arith.extui %8 : vector<8x8xi1> to vector<8x8xi32>
    %10 = arith.sitofp %9 : vector<8x8xi32> to vector<8x8xf32>
    %11 = tpu.iota {dimensions = array<i32: 1>} : vector<8x128xi32>
    %12 = tpu.iota {dimensions = array<i32: 0>} : vector<8x1xi32>
    %cst = arith.constant 0.000000e+00 : f32
    %13 = vector.broadcast %cst : f32 to vector<1x1xf32>
    %c0_i32_1 = arith.constant 0 : i32
    %c8_i32_2 = arith.constant 8 : i32
    %14 = arith.muli %c0_i32_1, %c8_i32_2 : i32
    %15 = tpu.assume_multiple %14, 8 : i32
    %16 = arith.index_cast %15 : i32 to index
    %c0 = arith.constant 0 : index
    %17 = vector.load %arg2[%16, %c0] : memref<8x128xf32, #tpu.memory_space<vmem>>, vector<8x128xf32>
    %c0_3 = arith.constant 0 : index
    %18 = arith.index_cast %c0_i32_1 : i32 to index
    %c0_4 = arith.constant 0 : index
    %19 = vector.load %arg3[%c0_3, %18, %c0_4] : memref<1x1x8xi32, #tpu.memory_space<vmem>>, vector<1x1x8xi32>
    %20 = vector.shape_cast %19 : vector<1x1x8xi32> to vector<1x8xi32>
    %21 = arith.sitofp %20 : vector<1x8xi32> to vector<1x8xf32>
    %22 = vector.broadcast %21 : vector<1x8xf32> to vector<8x8xf32>
    %23 = arith.mulf %10, %22 : vector<8x8xf32>
    %cst_5 = arith.constant dense<0.000000e+00> : vector<8xf32>
    %24 = vector.multi_reduction <add>, %23, %cst_5 [1] : vector<8x8xf32> to vector<8xf32>
    %25 = vector.shape_cast %24 : vector<8xf32> to vector<8x1xf32>
    %26 = arith.fptosi %25 : vector<8x1xf32> to vector<8x1xi32>
    %cst_6 = arith.constant dense<0xFF800000> : vector<8xf32>
    %27 = vector.multi_reduction <maximumf>, %17, %cst_6 [1] : vector<8x128xf32> to vector<8xf32>
    %28 = vector.shape_cast %27 : vector<8xf32> to vector<8x1xf32>
    %29 = vector.broadcast %28 : vector<8x1xf32> to vector<8x128xf32>
    %30 = arith.subf %17, %29 : vector<8x128xf32>
    %31 = math.exp %30 : vector<8x128xf32>
    %cst_7 = arith.constant dense<0.000000e+00> : vector<8xf32>
    %32 = vector.multi_reduction <add>, %31, %cst_7 [1] : vector<8x128xf32> to vector<8xf32>
    %33 = vector.shape_cast %32 : vector<8xf32> to vector<8x1xf32>
    %34 = math.log %33 : vector<8x1xf32>
    %35 = vector.broadcast %26 : vector<8x1xi32> to vector<8x128xi32>
    %36 = arith.cmpi eq, %11, %35 : vector<8x128xi32>
    %cst_8 = arith.constant 0.000000e+00 : f32
    %37 = vector.broadcast %cst_8 : f32 to vector<8x128xf32>
    %38 = arith.select %36, %30, %37 : vector<8x128xi1>, vector<8x128xf32>
    %cst_9 = arith.constant dense<0.000000e+00> : vector<8xf32>
    %39 = vector.multi_reduction <add>, %38, %cst_9 [1] : vector<8x128xf32> to vector<8xf32>
    %40 = vector.shape_cast %39 : vector<8xf32> to vector<8x1xf32>
    %41 = arith.subf %40, %34 : vector<8x1xf32>
    %cst_10 = arith.constant 0.000000e+00 : f32
    %42 = vector.broadcast %cst_10 : f32 to vector<8x1xf32>
    %43 = arith.subf %42, %41 : vector<8x1xf32>
    %44 = math.exp %41 : vector<8x1xf32>
    %cst_11 = arith.constant 1.000000e+00 : f32
    %45 = vector.broadcast %cst_11 : f32 to vector<8x1xf32>
    %46 = arith.subf %45, %44 : vector<8x1xf32>
    %47 = arith.mulf %46, %46 : vector<8x1xf32>
    %cst_12 = arith.constant 7.500000e-01 : f32
    %48 = vector.broadcast %cst_12 : f32 to vector<8x1xf32>
    %49 = arith.mulf %48, %47 : vector<8x1xf32>
    %50 = arith.mulf %49, %43 : vector<8x1xf32>
    %51 = arith.addi %5, %15 : i32
    %52 = vector.broadcast %51 : i32 to vector<8x1xi32>
    %53 = arith.addi %52, %12 : vector<8x1xi32>
    %c8_i32_13 = arith.constant 8 : i32
    %54 = vector.broadcast %c8_i32_13 : i32 to vector<8x1xi32>
    %55 = arith.cmpi slt, %53, %54 : vector<8x1xi32>
    %cst_14 = arith.constant 0.000000e+00 : f32
    %56 = vector.broadcast %cst_14 : f32 to vector<8x1xf32>
    %57 = arith.select %55, %50, %56 : vector<8x1xi1>, vector<8x1xf32>
    %cst_15 = arith.constant dense<0.000000e+00> : vector<1xf32>
    %58 = vector.multi_reduction <add>, %57, %cst_15 [0] : vector<8x1xf32> to vector<1xf32>
    %59 = vector.shape_cast %58 : vector<1xf32> to vector<1x1xf32>
    %60 = arith.addf %13, %59 : vector<1x1xf32>
    %c1_i32_16 = arith.constant 1 : i32
    %c0_17 = arith.constant 0 : index
    %c0_18 = arith.constant 0 : index
    %61 = vector.load %arg4[%c0_17, %c0_18] : memref<1x1xf32, #tpu.memory_space<vmem>>, vector<1x1xf32>
    %62 = arith.addf %61, %60 : vector<1x1xf32>
    %c0_19 = arith.constant 0 : index
    %c0_20 = arith.constant 0 : index
    %63 = vector.load %arg4[%c0_19, %c0_20] : memref<1x1xf32, #tpu.memory_space<vmem>>, vector<1x1xf32>
    tpu.vector_store %arg4[%c0_19, %c0_20], %62 {strides = array<i32>} : memref<1x1xf32, #tpu.memory_space<vmem>>, vector<1x1xf32>,
    return
  }
  func.func @transform_0(%arg0: i32, %arg1: i32) -> (i32, i32) {
    %c1_i32 = arith.constant 1 : i32
    %0 = arith.muli %arg0, %c1_i32 : i32
    %1 = arith.addi %0, %arg1 : i32
    %c0_i32 = arith.constant 0 : i32
    %2 = arith.minsi %1, %c0_i32 : i32
    %c0_i32_0 = arith.constant 0 : i32
    %c0_i32_1 = arith.constant 0 : i32
    return %2, %c0_i32_0 : i32, i32
  }
  func.func @transform_1(%arg0: i32, %arg1: i32) -> (i32, i32, i32) {
    %c1_i32 = arith.constant 1 : i32
    %0 = arith.muli %arg0, %c1_i32 : i32
    %1 = arith.addi %0, %arg1 : i32
    %c0_i32 = arith.constant 0 : i32
    %2 = arith.minsi %1, %c0_i32 : i32
    %c0_i32_0 = arith.constant 0 : i32
    %c0_i32_1 = arith.constant 0 : i32
    %c0_i32_2 = arith.constant 0 : i32
    return %2, %c0_i32_0, %c0_i32_1 : i32, i32, i32
  }
  func.func @transform_2(%arg0: i32, %arg1: i32) -> (i32, i32) {
    %c0_i32 = arith.constant 0 : i32
    %c0_i32_0 = arith.constant 0 : i32
    return %arg0, %c0_i32 : i32, i32
  }
}

</mosaic_0001>

<bundles_post_ra>
// kernel: tpu_custom_call.1
= control target key start
LH: loop header
LB: loop body
LE: loop exit
PB: predicated region body
PF: predicated region fallthrough
CT: control target
= control target key end

     0   :  { %7 = vsyncpa [#allocation3], 0  ;;  %s228_s0 = inlined_call_operand.hbm [shape: f32[8,128], index: 0, kind: input, shape index: {}]   ;;  %s229_s1 = inlined_call_operand.vmem [shape: s32[1,1,8], index: 1, kind: input, shape index: {}]   ;;  %s230_s2 = inlined_call_operand.hbm [shape: f32[1,1], index: 2, kind: output, shape index: {}]  }
   0x1   :  { %8 = vsyncpa [#allocation4], 0  ;;  %s199_s9 = smov [#allocation2]  }
   0x2   :  { %s20_s10 = sshll.u32 %s199_s9, 4  ;;  %s21_s10 = int_to_ptr.vmem [resolvable:$true] %s20_s10 }
   0x3   :  { %s163_s11 = scalar_lea.vmem %s21_s10, 128  ;;  %p168_p1 = scmp.lt.s32.totalorder %s21_s10, %s21_s10 }
   0x4   :  { %p164_p0 = scmp.ne.s32.totalorder %s21_s10, %s163_s11  ;;  %p169_p2 = scmp.lt.s32.totalorder %s163_s11, %s163_s11 }
   0x6   :  { %p170_p3 = por %p169_p2, %p168_p1 }
   0x8   :  { %p171_p4 = pnand %p170_p3, %p164_p0 }
   0xa   :  { %174 = shalt.err (!%p171_p4)
}
   0xb   :  { %23 = dma.hbm_to_vmem [thread:$0]  %s228_s0, 128, %s21_s10, [#allocation3]  }
   0xc   :  { %195 = dma.done.wait [#allocation3], 128  }
   0xd   :  { %196 = vsyncadd [#allocation3], 4294967168  ;;  %vm60_vm0 = vcmask 0   ;;  %v64_v0 = vlaneseq  ;;  %v200_v1 = vmov 0.0   ;;  %v71_v5 = vld [vmem:[#allocation2] sm:$0xff]  ;;  %vm81_vm2 = vcmask 64512  }
   0xe   :  { %61 = vst.msk [vmem:[#allocation5] sm:$0x1] %vm60_vm0, %v200_v1  ;;  %v72_v6 = vld [vmem:[%s229_s1] sm:$0x1]  ;;  %86 = vmax.xlane.f32.xlu0 %v71_v5  ;;  %s201_s0 = smov [#allocation5]  }
   0xf   :  { %v65_v2 = vshrl.u32 %v64_v0, 7  ;;  %v67_v3 = vand.u32 127, %v64_v0  ;;  %v73_v7 = vcvt.s32.f32 %v72_v6  ;;  %s129_s1 = sshll.u32 %s201_s0, 4  ;;  %s130_s1 = int_to_ptr.vmem [resolvable:$true] %s129_s1 }
  0x10   :  { %s175_s16 = scalar_lea.vmem %s130_s1, 16  ;;  %s179_s17 = scalar_lea.vmem %s130_s1, 32 }
  0x11   :  { %vm68_vm1 = vcmp.eq.s32.totalorder %v65_v2, %v67_v3  ;;  %v77_v4 = vsub.s32 0, %v65_v2  ;;  %p176_p5 = scmp.ne.s32.totalorder %s130_s1, %s175_s16  ;;  %p180_p6 = scmp.lt.s32.totalorder %s130_s1, %s130_s1 }
  0x12   :  { %v143_v8 = vsel %vm68_vm1, 1.0, %v200_v1  ;;  %p181_p7 = scmp.lt.s32.totalorder %s179_s17, %s175_s16 }
  0x13   :  { %v78_v9 = vrot.slane %v73_v7, %v77_v4 }
  0x14   :  { %p182_p8 = por %p181_p7, %p180_p6 }
  0x15   :  { %v80_v10 = vmul.f32 %v143_v8, %v78_v9  ;;  %v119_v37 = vld [vmem:[#allocation5] sm:$0x1] }
  0x16   :  { %p183_p9 = pnand %p182_p8, %p176_p5 }
  0x17   :  { %v82_v11 = vsel %vm81_vm2, %v80_v10, 0.0 }
  0x18   :  { %83 = vadd.xlane.f32.xlu0 %v82_v11 }
  0x97   :  { %v87_v12 = vpop.xlane.xlu0 %86 }
  0x98   :  { %v88_v13 = vsub.f32 %v71_v5, %v87_v12 }
  0x9a   :  { %v89_v14 = vmul.f32 1.442695, %v88_v13 }
  0x9c   :  { %149 = vpow2.f32 %v89_v14 }
  0xa1   :  { %v84_v15 = vpop.xlane.xlu0 %83 }
  0xa2   :  { %v144_v16 = vtrunc.f32 %v84_v15 }
  0xa4   :  { %v145_v17 = vcvt.f32.s32 %v144_v16 }
  0xa6   :  { %vm95_vm3 = vcmp.eq.s32.totalorder %v67_v3, %v145_v17 }
  0xa7   :  { %v96_v19 = vsel %vm95_vm3, %v88_v13, 0.0 }
  0xa9   :  { %v150_v18 = vpop.eup %149 }
  0xaa   :  { %91 = vadd.xlane.f32.xlu1 %v150_v18 }
  0xae   :  { %97 = vadd.xlane.f32.xlu1 %v96_v19 }
 0x133   :  { %v92_v20 = vpop.xlane.xlu1 %91 }
 0x134   :  { %151 = vlog2.f32 %v92_v20 }
 0x137   :  { %v98_v23 = vpop.xlane.xlu1 %97 }
 0x141   :  { %v152_v21 = vpop.eup %151 }
 0x142   :  { %v94_v22 = vmul.f32 0.6931472, %v152_v21 }
 0x144   :  { %v99_v24 = vsub.f32 %v98_v23, %v94_v22 }
 0x146   :  { %v101_v25 = vmul.f32 1.442695, %v99_v24  ;;  %v100_v29 = vsub.f32 0.0, %v99_v24 }
 0x148   :  { %153 = vpow2.f32 %v101_v25 }
 0x155   :  { %v154_v26 = vpop.eup %153 }
 0x156   :  { %v103_v27 = vsub.f32 1.0, %v154_v26 }
 0x158   :  { %v104_v28 = vmul.f32 %v103_v27, %v103_v27 }
 0x15a   :  { %v105_v30 = vmul.f32 0.75, %v104_v28 }
 0x15c   :  { %v106_v31 = vmul.f32 %v105_v30, %v100_v29 }
 0x15e   :  { %v112_v32 = vrot.slane %v106_v31, 4 }
 0x160   :  { %v113_v33 = vadd.f32 %v112_v32, %v106_v31 }
 0x162   :  { %v114_v34 = vrot.slane %v113_v33, 2 }
 0x164   :  { %v115_v35 = vadd.f32 %v114_v34, %v113_v33 }
 0x166   :  { %v116_v36 = vrot.slane %v115_v35, 1 }
 0x168   :  { %v117_v38 = vadd.f32 %v116_v36, %v115_v35 }
 0x16a   :  { %v120_v39 = vadd.f32 %v119_v37, %v117_v38 }
 0x16c   :  { %122 = vst.msk [vmem:[#allocation5] sm:$0x1] %vm60_vm0, %v120_v39 }
 0x16d   :  { %186 = shalt.err (!%p183_p9)
}
 0x16e   :  { %132 = dma.vmem_to_hbm [thread:$0]  %s130_s1, 16, %s230_s2, [#allocation4]  }
 0x16f   :  { %197 = dma.done.wait [#allocation4], 16  }
 0x170   :  { %198 = vsyncadd [#allocation4], 4294967280 }
 0x171   :  { %136 = vsyncpa [#allocation3], 1 }
 0x172   :  { %137 = vsyncpa [#allocation4], 1 }

</bundles_post_ra>
